<compile_context>
chip_gen: v6e
topology: v6e:2x2x1
jax: 0.10.0
libtpu: 0.0.40
codegen_flags: <defaults>
</compile_context>

<pallas_src>
import functools

import jax
import jax.numpy as jnp
from jax.experimental import pallas as pl
from jax.experimental.pallas import tpu as pltpu

LANE = 128
SUBLANE = 8
MAX_TILE_ROWS = 4096   # (4096, 128) f32 = 2 MiB per input per block
CHUNK_ROWS = 512       # in-kernel compute chunk (multiple of SUBLANE)


def _stable_bce(x, t):
    # Numerically stable BCE-with-logits (matches PyTorch):
    #   loss = max(x, 0) - x*t + log(1 + exp(-|x|))
    return jnp.maximum(x, 0.0) - x * t + jnp.log1p(jnp.exp(-jnp.abs(x)))


def _bce_sum_kernel(x_ref, y_ref, out_ref, acc_ref, *, tile_rows):
    """Mask-free streaming partial sum over (tile_rows, 128) blocks.

    Grid = (n_splits, steps_per_split); axis 0 is 'parallel' (megacore split on
    v7x), axis 1 is the sequential reduction axis. Each split writes its own
    lane-dense (8, 128) partial; the wrapper adds them and divides by N.
    """
    i = pl.program_id(1)

    @pl.when(i == 0)
    def _():
        acc_ref[...] = jnp.zeros_like(acc_ref)

    # Chunked, elementwise-only accumulation (VPU adds); no cross-lane reduce
    # anywhere in the kernel.
    for s in range(0, tile_rows, CHUNK_ROWS):           # static trip count
        rows = min(CHUNK_ROWS, tile_rows - s)            # multiple of SUBLANE
        x = x_ref[s:s + rows, :].astype(jnp.float32)     # in-kernel upcast
        t = y_ref[s:s + rows, :].astype(jnp.float32)
        loss = _stable_bce(x, t)
        acc_ref[...] += loss.reshape(rows // SUBLANE, SUBLANE, LANE).sum(axis=0)

    @pl.when(i == pl.num_programs(1) - 1)
    def _():
        out_ref[...] = acc_ref[...]                      # lane-dense unmasked store


def _bce_tail_kernel(x_ref, y_ref, out_ref, *, tile_rows, n_valid):
    """Single small padded block (< one main tile) with a lane-level mask."""
    acc = jnp.zeros((SUBLANE, LANE), jnp.float32)
    for s in range(0, tile_rows, CHUNK_ROWS):
        rows = min(CHUNK_ROWS, tile_rows - s)
        x = x_ref[s:s + rows, :].astype(jnp.float32)
        t = y_ref[s:s + rows, :].astype(jnp.float32)
        loss = _stable_bce(x, t)
        # Global element index within the tail; bounded by tile_elems << 2**31,
        # so int32 is safe here (the big main stream never masks).
        row = jax.lax.broadcasted_iota(jnp.int32, (rows, LANE), 0)
        lane = jax.lax.broadcasted_iota(jnp.int32, (rows, LANE), 1)
        gidx = (s + row) * LANE + lane
        loss = jnp.where(gidx < n_valid, loss, 0.0)
        acc = acc + loss.reshape(rows // SUBLANE, SUBLANE, LANE).sum(axis=0)
    out_ref[...] = jnp.sum(acc, keepdims=True)


def bce_with_logits_loss(yhat, y):
    """Equivalent of nn.BCEWithLogitsLoss() (reduction='mean')."""
    assert yhat.shape == y.shape
    n_valid = int(yhat.size)

    # Native dtype end-to-end; the f32 upcast happens on the VPU in-kernel.
    xf = jnp.ravel(yhat)
    yf = jnp.ravel(y)

    # Tile height: as large as possible (<= MAX_TILE_ROWS), multiple of 8.
    rows_needed = -(-n_valid // LANE) if n_valid else SUBLANE
    tile_rows = min(MAX_TILE_ROWS,
                    max(SUBLANE, -(-rows_needed // SUBLANE) * SUBLANE))
    tile_elems = tile_rows * LANE

    n_main = (n_valid // tile_elems) * tile_elems   # pad-free, mask-free prefix
    n_tail = n_valid - n_main                       # < tile_elems

    total = jnp.float32(0.0)

    if n_main:
        steps = n_main // tile_elems
        # Split the row range over two cores when it divides evenly: ~2x on
        # v7x (2 TCs per chip); a harmless serial loop on v5e/v6e (1 TC).
        n_splits = 2 if (steps >= 2 and steps % 2 == 0) else 1
        steps_per_split = steps // n_splits

        x2 = xf[:n_main].reshape(n_main // LANE, LANE)   # copy-free prefix view
        y2 = yf[:n_main].reshape(n_main // LANE, LANE)

        cost = pl.CostEstimate(
            flops=5 * n_main,
            transcendentals=2 * n_main,
            bytes_accessed=n_main * (x2.dtype.itemsize + y2.dtype.itemsize)
            + n_splits * SUBLANE * LANE * 4,
        )

        kernel = functools.partial(_bce_sum_kernel, tile_rows=tile_rows)
        # TODO(synk): if xprof ever shows exposed DMA at step boundaries, add
        # pipeline_mode=pl.Buffered(3) to the two input BlockSpecs instead of
        # shrinking the block.
        partials = pl.pallas_call(
            kernel,
            out_shape=jax.ShapeDtypeStruct((n_splits * SUBLANE, LANE),
                                           jnp.float32),
            grid=(n_splits, steps_per_split),
            in_specs=[
                pl.BlockSpec((tile_rows, LANE),
                             lambda c, i: (c * steps_per_split + i, 0)),
                pl.BlockSpec((tile_rows, LANE),
                             lambda c, i: (c * steps_per_split + i, 0)),
            ],
            out_specs=pl.BlockSpec((SUBLANE, LANE), lambda c, i: (c, 0)),
            scratch_shapes=[pltpu.VMEM((SUBLANE, LANE), jnp.float32)],
            compiler_params=pltpu.CompilerParams(
                dimension_semantics=("parallel", "arbitrary"),
            ),
            cost_estimate=cost,
        )(x2, y2)
        total = total + jnp.sum(partials, dtype=jnp.float32)

    if n_tail:
        tail_rows_needed = -(-n_tail // LANE)
        tail_rows = -(-tail_rows_needed // SUBLANE) * SUBLANE
        pad = tail_rows * LANE - n_tail
        # Only the (< tile_elems) tail is ever padded/copied.
        xt = jnp.pad(xf[n_main:], (0, pad)).reshape(tail_rows, LANE)
        yt = jnp.pad(yf[n_main:], (0, pad)).reshape(tail_rows, LANE)

        tail_kernel = functools.partial(
            _bce_tail_kernel, tile_rows=tail_rows, n_valid=n_tail)
        tail_sum = pl.pallas_call(
            tail_kernel,
            out_shape=jax.ShapeDtypeStruct((1, 1), jnp.float32),
            grid=(1,),
            in_specs=[
                pl.BlockSpec((tail_rows, LANE), lambda i: (0, 0)),
                pl.BlockSpec((tail_rows, LANE), lambda i: (0, 0)),
            ],
            out_specs=pl.BlockSpec((1, 1), lambda i: (0, 0)),
        )(xt, yt)
        total = total + tail_sum[0, 0]

    # n_valid == 0 -> 0/0 = nan, matching torch's empty-input behaviour.
    return total / jnp.float32(n_valid)


def _reference(yhat, y):
    x = yhat.astype(jnp.float32)
    t = y.astype(jnp.float32)
    return jnp.mean(_stable_bce(x, t))


if __name__ == "__main__":
    key = jax.random.PRNGKey(0)
    k1, k2 = jax.random.split(key)

    # Small NCHW-like shape consistent with a CNN head producing logits.
    shape = (2, 4, 16, 16)
    yhat = jax.random.normal(k1, shape, dtype=jnp.float32)
    y = (jax.random.uniform(k2, shape) > 0.5).astype(jnp.float32)

    loss = bce_with_logits_loss(yhat, y)
    jax.block_until_ready(loss)
    ref = _reference(yhat, y)
    assert jnp.allclose(loss, ref, atol=1e-5, rtol=1e-5), (loss, ref)

    # Shape needing a masked tail block (not a multiple of 128).
    shape2 = (3, 5, 17, 13)
    yhat2 = jax.random.normal(k1, shape2, dtype=jnp.float32)
    y2 = (jax.random.uniform(k2, shape2) > 0.5).astype(jnp.float32)
    loss2 = bce_with_logits_loss(yhat2, y2)
    jax.block_until_ready(loss2)
    assert jnp.allclose(loss2, _reference(yhat2, y2), atol=1e-5, rtol=1e-5)

    # Larger flat input: exercises multiple grid steps, the 2-way parallel
    # split, and the tail path together.
    n3 = 2 ** 20 + 37
    yhat3 = jax.random.normal(k1, (n3,), dtype=jnp.float32)
    y3 = (jax.random.uniform(k2, (n3,)) > 0.5).astype(jnp.float32)
    loss3 = bce_with_logits_loss(yhat3, y3)
    jax.block_until_ready(loss3)
    assert jnp.allclose(loss3, _reference(yhat3, y3), atol=1e-5, rtol=1e-4)

    print("KERNEL_OK")
</pallas_src>

<mosaic_0001>
module attributes {stable_mosaic.version = 11 : i64} {
  func.func @_bce_sum_kernel(%arg0: i32, %arg1: i32, %arg2: memref<16x128xf32, #tpu.memory_space<vmem>>, %arg3: memref<16x128xf32, #tpu.memory_space<vmem>>, %arg4: memref<8x128xf32, #tpu.memory_space<vmem>>, %arg5: memref<8x128xf32, #tpu.memory_space<vmem>>) attributes {dimension_semantics = [#tpu.dimension_semantics<parallel>, #tpu.dimension_semantics<arbitrary>], iteration_bounds = array<i64: 1, 1>, scalar_prefetch = 0 : i64, scratch_operands = 1 : i64, tpu.core_type = #tpu.core_type<tc>, window_params = [{transform_indices = @transform_0, window_bounds = array<i64: 16, 128>}, {transform_indices = @transform_1, window_bounds = array<i64: 16, 128>}, {transform_indices = @transform_2, window_bounds = array<i64: 8, 128>}]} {
    %c0_i32 = arith.constant 0 : i32
    %0 = arith.cmpi eq, %arg1, %c0_i32 : i32
    %1 = arith.extui %0 : i1 to i32
    %c0_i32_0 = arith.constant 0 : i32
    %2 = arith.cmpi ne, %1, %c0_i32_0 : i32
    scf.if %2 {
      %cst_12 = arith.constant 0.000000e+00 : f32
      %23 = vector.broadcast %cst_12 : f32 to vector<8x128xf32>
      %c0_13 = arith.constant 0 : index
      %c0_14 = arith.constant 0 : index
      %24 = vector.load %arg5[%c0_13, %c0_14] : memref<8x128xf32, #tpu.memory_space<vmem>>, vector<8x128xf32>
      tpu.vector_store %arg5[%c0_13, %c0_14], %23 {strides = array<i32>} : memref<8x128xf32, #tpu.memory_space<vmem>>, vector<8x128xf32>,
    } else {
    }
    %c0 = arith.constant 0 : index
    %c0_1 = arith.constant 0 : index
    %3 = vector.load %arg2[%c0, %c0_1] : memref<16x128xf32, #tpu.memory_space<vmem>>, vector<16x128xf32>
    %c0_2 = arith.constant 0 : index
    %c0_3 = arith.constant 0 : index
    %4 = vector.load %arg3[%c0_2, %c0_3] : memref<16x128xf32, #tpu.memory_space<vmem>>, vector<16x128xf32>
    %cst = arith.constant 0.000000e+00 : f32
    %5 = vector.broadcast %cst : f32 to vector<16x128xf32>
    %6 = arith.maximumf %3, %5 : vector<16x128xf32>
    %7 = arith.mulf %3, %4 : vector<16x128xf32>
    %8 = arith.subf %6, %7 : vector<16x128xf32>
    %9 = math.absf %3 : vector<16x128xf32>
    %cst_4 = arith.constant 0.000000e+00 : f32
    %10 = vector.broadcast %cst_4 : f32 to vector<16x128xf32>
    %11 = arith.subf %10, %9 : vector<16x128xf32>
    %12 = math.exp %11 : vector<16x128xf32>
    %13 = math.log1p %12 : vector<16x128xf32>
    %14 = arith.addf %8, %13 : vector<16x128xf32>
    %c0_5 = arith.constant 0 : index
    %c0_6 = arith.constant 0 : index
    %15 = vector.load %arg5[%c0_5, %c0_6] : memref<8x128xf32, #tpu.memory_space<vmem>>, vector<8x128xf32>
    %16 = vector.shape_cast %14 : vector<16x128xf32> to vector<2x8x128xf32>
    %cst_7 = arith.constant dense<0.000000e+00> : vector<8x128xf32>
    %17 = vector.multi_reduction <add>, %16, %cst_7 [0] : vector<2x8x128xf32> to vector<8x128xf32>
    %18 = arith.addf %15, %17 : vector<8x128xf32>
    %c0_8 = arith.constant 0 : index
    %c0_9 = arith.constant 0 : index
    %19 = vector.load %arg5[%c0_8, %c0_9] : memref<8x128xf32, #tpu.memory_space<vmem>>, vector<8x128xf32>
    tpu.vector_store %arg5[%c0_8, %c0_9], %18 {strides = array<i32>} : memref<8x128xf32, #tpu.memory_space<vmem>>, vector<8x128xf32>,
    %c0_i32_10 = arith.constant 0 : i32
    %20 = arith.cmpi eq, %arg1, %c0_i32_10 : i32
    %21 = arith.extui %20 : i1 to i32
    %c0_i32_11 = arith.constant 0 : i32
    %22 = arith.cmpi ne, %21, %c0_i32_11 : i32
    scf.if %22 {
      %c0_12 = arith.constant 0 : index
      %c0_13 = arith.constant 0 : index
      %23 = vector.load %arg5[%c0_12, %c0_13] : memref<8x128xf32, #tpu.memory_space<vmem>>, vector<8x128xf32>
      %c0_14 = arith.constant 0 : index
      %c0_15 = arith.constant 0 : index
      %24 = vector.load %arg4[%c0_14, %c0_15] : memref<8x128xf32, #tpu.memory_space<vmem>>, vector<8x128xf32>
      tpu.vector_store %arg4[%c0_14, %c0_15], %23 {strides = array<i32>} : memref<8x128xf32, #tpu.memory_space<vmem>>, vector<8x128xf32>,
    } else {
    }
    return
  }
  func.func @transform_0(%arg0: i32, %arg1: i32) -> (i32, i32) {
    %c1_i32 = arith.constant 1 : i32
    %0 = arith.muli %arg0, %c1_i32 : i32
    %1 = arith.addi %0, %arg1 : i32
    %c0_i32 = arith.constant 0 : i32
    %c0_i32_0 = arith.constant 0 : i32
    return %1, %c0_i32 : i32, i32
  }
  func.func @transform_1(%arg0: i32, %arg1: i32) -> (i32, i32) {
    %c1_i32 = arith.constant 1 : i32
    %0 = arith.muli %arg0, %c1_i32 : i32
    %1 = arith.addi %0, %arg1 : i32
    %c0_i32 = arith.constant 0 : i32
    %c0_i32_0 = arith.constant 0 : i32
    return %1, %c0_i32 : i32, i32
  }
  func.func @transform_2(%arg0: i32, %arg1: i32) -> (i32, i32) {
    %c0_i32 = arith.constant 0 : i32
    %c0_i32_0 = arith.constant 0 : i32
    return %arg0, %c0_i32 : i32, i32
  }
}

</mosaic_0001>

<bundles_post_ra>
// kernel: tpu_custom_call.1
= control target key start
LH: loop header
LB: loop body
LE: loop exit
PB: predicated region body
PF: predicated region fallthrough
CT: control target
= control target key end

     0   :  { %7 = vsyncpa [#allocation4], 0  ;;  %s228_s0 = inlined_call_operand.hbm [shape: f32[16,128], index: 0, kind: input, shape index: {}]   ;;  %s229_s1 = inlined_call_operand.hbm [shape: f32[16,128], index: 1, kind: input, shape index: {}]   ;;  %s230_s2 = inlined_call_operand.hbm [shape: f32[8,128], index: 2, kind: output, shape index: {}]  }
   0x1   :  { %8 = vsyncpa [#allocation7], 0 }
   0x2   :  { %9 = vsyncpa [#allocation5], 0  ;;  %s199_s9 = smov [#allocation3]  }
   0x3   :  { %s19_s10 = sshll.u32 %s199_s9, 4  ;;  %s20_s10 = int_to_ptr.vmem [resolvable:$true] %s19_s10 }
   0x4   :  { %s141_s11 = scalar_lea.vmem %s20_s10, 256  ;;  %p146_p1 = scmp.lt.s32.totalorder %s20_s10, %s20_s10 }
   0x5   :  { %p142_p0 = scmp.ne.s32.totalorder %s20_s10, %s141_s11  ;;  %p147_p2 = scmp.lt.s32.totalorder %s141_s11, %s141_s11 }
   0x7   :  { %p148_p3 = por %p147_p2, %p146_p1 }
   0x9   :  { %p149_p4 = pnand %p148_p3, %p142_p0 }
   0xb   :  { %152 = shalt.err (!%p149_p4)
}
   0xc   :  { %s200_s12 = smov 128   ;;  %s201_s13 = smov 8  }
   0xd   :  { %25 = dma.hbm_to_vmem [thread:$0]  %s228_s0, 256, %s20_s10, [#allocation4], %s200_s12, %s200_s12, %s201_s13  }
   0xe   :  { %s202_s16 = smov [#allocation6]  }
   0xf   :  { %s35_s17 = sshll.u32 %s202_s16, 4  ;;  %s36_s17 = int_to_ptr.vmem [resolvable:$true] %s35_s17 }
  0x10   :  { %s161_s18 = scalar_lea.vmem %s36_s17, 256  ;;  %p166_p6 = scmp.lt.s32.totalorder %s36_s17, %s36_s17 }
  0x11   :  { %p162_p5 = scmp.ne.s32.totalorder %s36_s17, %s161_s18  ;;  %p167_p7 = scmp.lt.s32.totalorder %s161_s18, %s161_s18 }
  0x13   :  { %p168_p8 = por %p167_p7, %p166_p6 }
  0x15   :  { %p169_p9 = pnand %p168_p8, %p162_p5 }
  0x17   :  { %172 = shalt.err (!%p169_p9)
}
  0x18   :  { %41 = dma.hbm_to_vmem [thread:$0]  %s229_s1, 256, %s36_s17, [#allocation7], %s200_s12, %s200_s12, %s201_s13  }
  0x19   :  { %193 = dma.done.wait [#allocation4], 256  }
  0x1a   :  { %194 = vsyncadd [#allocation4], 4294967040 }
  0x1b   :  { %195 = dma.done.wait [#allocation7], 256  }
  0x1c   :  { %196 = vsyncadd [#allocation7], 4294967040  ;;  %v57_v0 = vld [vmem:[#allocation3] sm:$0xff]  ;;  %v58_v1 = vld [vmem:[#allocation3 + $0x8] sm:$0xff]  ;;  %s203_s0 = smov [#allocation8]  }
  0x1d   :  { %v67_v2 = vand.u32 2147483647, %v57_v0  ;;  %v68_v3 = vand.u32 2147483647, %v58_v1  ;;  %v59_v14 = vld [vmem:[#allocation6] sm:$0xff]  ;;  %v60_v15 = vld [vmem:[#allocation6 + $0x8] sm:$0xff] }
  0x1e   :  { %v61_v17 = vmax.f32 %v57_v0, 0.0  ;;  %v63_v18 = vmul.f32 %v59_v14, %v57_v0  ;;  %v62_v21 = vmax.f32 %v58_v1, 0.0  ;;  %v64_v22 = vmul.f32 %v60_v15, %v58_v1  ;;  %s110_s1 = sshll.u32 %s203_s0, 4  ;;  %s111_s1 = int_to_ptr.vmem [resolvable:$true] %s110_s1 }
  0x1f   :  { %v69_v4 = vsub.f32 0.0, %v67_v2  ;;  %v70_v5 = vsub.f32 0.0, %v68_v3  ;;  %s173_s21 = scalar_lea.vmem %s111_s1, 128  ;;  %p178_p11 = scmp.lt.s32.totalorder %s111_s1, %s111_s1 }
  0x20   :  { %v65_v26 = vsub.f32 %v61_v17, %v63_v18  ;;  %v66_v29 = vsub.f32 %v62_v21, %v64_v22  ;;  %p174_p10 = scmp.ne.s32.totalorder %s111_s1, %s173_s21  ;;  %p179_p12 = scmp.lt.s32.totalorder %s173_s21, %s173_s21 }
  0x21   :  { %v71_v6 = vmul.f32 1.442695, %v69_v4  ;;  %v73_v7 = vmul.f32 1.442695, %v70_v5 }
  0x22   :  { %p180_p13 = por %p179_p12, %p178_p11 }
  0x23   :  { %125 = vpow2.f32 %v71_v6 }
  0x24   :  { %127 = vpow2.f32 %v73_v7  ;;  %p181_p0 = pnand %p180_p13, %p174_p10 }
  0x30   :  { %v126_v8 = vpop.eup %125 }
  0x31   :  { %v128_v9 = vpop.eup %127  ;;  %v75_v10 = vadd.f32 1.0, %v126_v8  ;;  %v78_v12 = vmul.f32 -0.5, %v126_v8  ;;  %v81_v19 = vand.u32 2147483647, %v126_v8 }
  0x32   :  { %v84_v11 = vadd.f32 1.0, %v128_v9  ;;  %v87_v13 = vmul.f32 -0.5, %v128_v9  ;;  %v90_v23 = vand.u32 2147483647, %v128_v9 }
  0x33   :  { %129 = vlog2.f32 %v75_v10  ;;  %v79_v16 = vadd.f32 1.0, %v78_v12  ;;  %vm82_vm0 = vcmp.lt.f32.partialorder %v81_v19, 0.0004427343 }
  0x34   :  { %131 = vlog2.f32 %v84_v11  ;;  %v88_v20 = vadd.f32 1.0, %v87_v13  ;;  %vm91_vm1 = vcmp.lt.f32.partialorder %v90_v23, 0.0004427343 }
  0x35   :  { %v80_v24 = vmul.f32 %v126_v8, %v79_v16 }
  0x36   :  { %v89_v27 = vmul.f32 %v128_v9, %v88_v20 }
  0x40   :  { %v130_v25 = vpop.eup %129 }
  0x41   :  { %v132_v28 = vpop.eup %131  ;;  %v77_v30 = vmul.f32 0.6931472, %v130_v25 }
  0x42   :  { %v86_v31 = vmul.f32 0.6931472, %v132_v28 }
  0x43   :  { %v83_v32 = vsel %vm82_vm0, %v80_v24, %v77_v30 }
  0x44   :  { %v92_v33 = vsel %vm91_vm1, %v89_v27, %v86_v31  ;;  %v93_v34 = vadd.f32 %v83_v32, %v65_v26 }
  0x45   :  { %v94_v35 = vadd.f32 %v92_v33, %v66_v29 }
  0x47   :  { %v96_v36 = vadd.f32 %v94_v35, %v93_v34 }
  0x49   :  { %103 = vst [vmem:[#allocation8] sm:$0xff] %v96_v36 }
  0x4a   :  { %184 = shalt.err (!%p181_p0)
}
  0x4b   :  { %113 = dma.vmem_to_hbm [thread:$0]  %s111_s1, 128, %s230_s2, [#allocation5]  }
  0x4c   :  { %197 = dma.done.wait [#allocation5], 128  }
  0x4d   :  { %198 = vsyncadd [#allocation5], 4294967168 }
  0x4e   :  { %117 = vsyncpa [#allocation4], 1 }
  0x4f   :  { %118 = vsyncpa [#allocation7], 1 }
  0x50   :  { %119 = vsyncpa [#allocation5], 1 }

</bundles_post_ra>
